<compile_context>
chip_gen: v7x
topology: tpu7x:2x2x1
jax: 0.10.0
libtpu: 0.0.40
codegen_flags: <defaults>
</compile_context>

<pallas_src>
import functools

import jax
import jax.numpy as jnp
from jax import lax
from jax.experimental import pallas as pl
from jax.experimental.pallas import tpu as pltpu

EPS = 1e-8

# Shard the batch (reduction) axis over 2 TensorCores; on 1-TC chips (v5e/v6e)
# the extra grid value is just one more sequential outer step (no-op cost).
_NUM_CORES = 2


def _fold_to_8(x):
    """[TB, C] -> [8, C] partial sums using cross-vreg VALU adds only.

    The final sublane collapse (XLU) is deferred to the plain-JAX epilogue
    instead of paying one XLU reduce per moment per grid step.
    """
    tb, c = x.shape
    return jnp.sum(x.reshape(tb // 8, 8, c), axis=0)


def _dist_partials_kernel(zs_ref, zt_ref, mom_ref, inter_ref, *,
                          inv_tau, n_rows, n_cols, block_b, blocks_per_core,
                          needs_mask):
    """Accumulates per-core partials directly into the VMEM-resident outputs.

    mom_ref:   (1, 5, 8, C) -- sublane partials of sum ys, yt, ys*ys, yt*yt, ys*yt
    inter_ref: (1, 8, 1)    -- sublane partials of the per-row inter pearson sum
    """
    core = pl.program_id(0)
    i = pl.program_id(1)

    # Output blocks are revisited across the inner ("arbitrary") axis, so they
    # double as accumulators: zero them on the first visit of each core.
    @pl.when(i == 0)
    def _init():
        mom_ref[...] = jnp.zeros_like(mom_ref)
        inter_ref[...] = jnp.zeros_like(inter_ref)

    zs = zs_ref[...].astype(jnp.float32)      # bf16 inputs upcast here
    zt = zt_ref[...].astype(jnp.float32)
    if inv_tau != 1.0:                        # static: skipped entirely for tau == 1
        zs = zs * inv_tau                     # multiply by precomputed 1/tau
        zt = zt * inv_tau

    # ---- numerically stable softmax over classes (lane axis) ---------------
    zs = zs - jnp.max(zs, axis=1, keepdims=True)
    zt = zt - jnp.max(zt, axis=1, keepdims=True)
    es = jnp.exp(zs)                          # EUP
    et = jnp.exp(zt)
    # One exact reciprocal per *row* + a per-element multiply instead of a
    # per-element divide; kept exact so the intra moments stay accurate.
    ys = es * pl.reciprocal(jnp.sum(es, axis=1, keepdims=True), approx=False)
    yt = et * pl.reciprocal(jnp.sum(et, axis=1, keepdims=True), approx=False)

    # Pearson is shift invariant: work on (y - 1/C).  This recenters the
    # streamed moments (avoids cancellation in sum(x^2) - sum(x)^2/B) and the
    # inter-class rows are then already zero-mean (softmax rows sum to 1), so
    # no explicit re-centering is needed below.
    inv_c = 1.0 / float(n_cols)
    ysc = ys - inv_c
    ytc = yt - inv_c

    if needs_mask:                            # static: only when padding exists
        # TODO(synk): gate this iota + 2 selects/element behind lax.cond on the
        # single ragged/padded block instead of paying it on every block.
        blk = core * blocks_per_core + i      # unclamped global block index
        rows = lax.broadcasted_iota(jnp.int32, (block_b, 1), 0) + blk * block_b
        valid = rows < n_rows
        ysc = jnp.where(valid, ysc, 0.0)      # padded rows contribute nothing
        ytc = jnp.where(valid, ytc, 0.0)

    # ---- inter-class relation: pearson along C, one value per row ----------
    # Rows are already zero-mean -> 3 lane (XLU) reductions instead of 5.
    num = jnp.sum(ysc * ytc, axis=1, keepdims=True)
    den = (jnp.sqrt(jnp.sum(ysc * ysc, axis=1, keepdims=True))
           * jnp.sqrt(jnp.sum(ytc * ytc, axis=1, keepdims=True)) + EPS)
    # Exact reciprocal: when student ~= teacher (|pearson| -> 1) the approx
    # EUP error could exceed tolerance; this is only O(block_b) work.
    pear_rows = num * pl.reciprocal(den, approx=False)        # [TB, 1]
    inter_ref[0] += _fold_to_8(pear_rows)                     # [8, 1] partials

    # ---- intra-class relation: stream per-class moments over the batch -----
    # TODO(synk): on compute-bound v6e/v7x configs these VALU batch folds could
    # move to the idle MXU via a ones/selection matmul (mask first, HIGHEST
    # precision) for ~20% less VALU pressure.
    mom_ref[0, 0] += _fold_to_8(ysc)
    mom_ref[0, 1] += _fold_to_8(ytc)
    mom_ref[0, 2] += _fold_to_8(ysc * ysc)
    mom_ref[0, 3] += _fold_to_8(ytc * ytc)
    mom_ref[0, 4] += _fold_to_8(ysc * ytc)


def _vmem_budgets():
    """Generation-aware VMEM sizing: ~70% of per-core capacity as the scoped
    limit, half of that as the input-tile budget."""
    try:
        cap = int(pltpu.get_tpu_info().vmem_capacity_bytes)
    except Exception:
        cap = 0
    if cap <= 0:
        cap = 64 * 1024 * 1024                 # conservative: v7x per-core VMEM
    limit = max(32 * 1024 * 1024, min(int(0.7 * cap), 96 * 1024 * 1024))
    return limit, limit // 2


def _choose_block_b(n_rows, n_cols, dtype, vmem_budget_bytes, num_cores):
    """Batch tile: fits the VMEM budget, but small enough that each core gets
    >= ~4 pipelined grid steps (DMA/compute overlap), capped at 512 rows."""
    itemsize = jnp.dtype(dtype).itemsize
    mult = max(8, 32 // max(itemsize, 1))          # 8 f32 / 16 bf16 / 32 int8
    # 2 inputs x 2 pipeline buffers (input dtype) + ~10 live f32 temporaries.
    per_row_bytes = n_cols * (4 * itemsize + 10 * 4)
    fit = max(1, vmem_budget_bytes // max(per_row_bytes, 1))
    rows_per_core = -(-n_rows // num_cores)
    target = -(-rows_per_core // 4)                # aim for >= 4 steps per core
    target = -(-target // mult) * mult             # round up to sublane packing
    tb = min(int(fit), int(target), 512)
    return max(mult, (tb // mult) * mult)


def relation_dist_loss(z_s, z_t, *, beta=1.0, gamma=1.0, tau=1.0,
                       block_b=None, num_cores=_NUM_CORES):
    """RelationDistLoss.forward(z_s, z_t) -> scalar kd_loss (f32)."""
    assert z_s.shape == z_t.shape and z_s.ndim == 2
    n_rows, n_cols = z_s.shape

    vmem_limit, tile_budget = _vmem_budgets()
    if block_b is None:
        block_b = _choose_block_b(n_rows, n_cols, z_s.dtype, tile_budget, num_cores)
    assert block_b >= 8 and block_b % 8 == 0, block_b

    n_valid_blocks = pl.cdiv(n_rows, block_b)
    blocks_per_core = pl.cdiv(n_valid_blocks, num_cores)
    # padding exists if the last block is ragged OR a core got a dummy block
    needs_mask = (num_cores * blocks_per_core * block_b) != n_rows

    tau = float(tau)
    coef_inter = float(beta) * tau * tau
    coef_intra = float(gamma) * tau * tau

    kernel = functools.partial(
        _dist_partials_kernel,
        inv_tau=1.0 / tau, n_rows=n_rows, n_cols=n_cols, block_b=block_b,
        blocks_per_core=blocks_per_core, needs_mask=needs_mask)

    def in_map(c, i):
        # Clamp so a core's trailing dummy block re-reads the last valid block
        # (its global rows are >= n_rows and are masked to zero in the kernel);
        # avoids DMAing a fully out-of-bounds window.
        return (jnp.minimum(c * blocks_per_core + i, n_valid_blocks - 1), 0)

    # TODO(synk): if C is too wide for a single lane block, also tile C with a
    # two-level (online-softmax style) accumulation.
    # TODO(synk): sweep pipeline_mode=pl.Buffered(3) on the input specs for the
    # HBM-bound v5e configs once tiles are small / steps are many.
    grid_spec = pltpu.PrefetchScalarGridSpec(
        num_scalar_prefetch=0,
        grid=(num_cores, blocks_per_core),
        in_specs=[pl.BlockSpec((block_b, n_cols), in_map),
                  pl.BlockSpec((block_b, n_cols), in_map)],
        out_specs=[pl.BlockSpec((1, 5, 8, n_cols), lambda c, i: (c, 0, 0, 0)),
                   pl.BlockSpec((1, 8, 1), lambda c, i: (c, 0, 0))],
    )

    mom_parts, inter_parts = pl.pallas_call(
        kernel,
        out_shape=(jax.ShapeDtypeStruct((num_cores, 5, 8, n_cols), jnp.float32),
                   jax.ShapeDtypeStruct((num_cores, 8, 1), jnp.float32)),
        grid_spec=grid_spec,
        compiler_params=pltpu.CompilerParams(
            # core axis is sharded across TensorCores; the batch axis carries
            # the accumulators -> reduction ("arbitrary")
            dimension_semantics=("parallel", "arbitrary"),
            vmem_limit_bytes=vmem_limit,
        ),
    )(z_s, z_t)

    # ---- tiny cross-core combine + pearson finalize, in plain JAX ----------
    inv_b = 1.0 / float(n_rows)
    mom = jnp.sum(mom_parts, axis=(0, 2))               # [5, C]: cores + sublanes
    s, t, ss, tt, st = mom[0], mom[1], mom[2], mom[3], mom[4]
    inter = 1.0 - jnp.sum(inter_parts) * inv_b

    cov = st - s * t * inv_b
    var_s = jnp.maximum(ss - s * s * inv_b, 0.0)
    var_t = jnp.maximum(tt - t * t * inv_b, 0.0)
    den = jnp.sqrt(var_s) * jnp.sqrt(var_t) + EPS
    intra = 1.0 - jnp.sum(cov / den) / float(n_cols)

    return coef_inter * inter + coef_intra * intra


def _pearson_ref(a, b, axis, eps=EPS):
    a = a - jnp.mean(a, axis=axis, keepdims=True)
    b = b - jnp.mean(b, axis=axis, keepdims=True)
    num = jnp.sum(a * b, axis=axis)
    den = jnp.sqrt(jnp.sum(a * a, axis=axis)) * jnp.sqrt(jnp.sum(b * b, axis=axis)) + eps
    return num / den


def _reference(z_s, z_t, beta=1.0, gamma=1.0, tau=1.0):
    """Pure-JAX reference mirroring the PyTorch module."""
    y_s = jax.nn.softmax(z_s / tau, axis=1)
    y_t = jax.nn.softmax(z_t / tau, axis=1)
    inter = 1.0 - jnp.mean(_pearson_ref(y_s, y_t, axis=1))
    intra = 1.0 - jnp.mean(_pearson_ref(y_s, y_t, axis=0))
    return beta * tau ** 2 * inter + gamma * tau ** 2 * intra


if __name__ == "__main__":
    key = jax.random.PRNGKey(0)
    # (B, C, input dtype, explicit batch tile, beta, gamma, tau)
    checks = [
        (64, 128, jnp.float32, 16, 1.0, 1.0, 1.0),     # grid (2, 2), no masking
        (96, 128, jnp.float32, None, 1.0, 1.0, 1.0),   # auto tile -> multi-step/core
        (20, 256, jnp.float32, 16, 1.0, 1.0, 1.0),     # ragged tail (masked rows)
        (32, 128, jnp.bfloat16, None, 0.5, 2.0, 2.0),  # bf16 inputs, non-default params
    ]
    for (B, C, dtype, tb, beta, gamma, tau) in checks:
        key, k1, k2 = jax.random.split(key, 3)
        z_s = jax.random.normal(k1, (B, C), dtype=jnp.float32).astype(dtype)
        z_t = jax.random.normal(k2, (B, C), dtype=jnp.float32).astype(dtype)

        loss = relation_dist_loss(z_s, z_t, beta=beta, gamma=gamma, tau=tau, block_b=tb)
        loss = jax.block_until_ready(loss)

        ref = _reference(z_s.astype(jnp.float32), z_t.astype(jnp.float32),
                         beta=beta, gamma=gamma, tau=tau)
        assert jnp.allclose(loss, ref, atol=2e-4, rtol=2e-4), (B, C, str(dtype), loss, ref)
    print("KERNEL_OK")
</pallas_src>

<mosaic_0001>
module attributes {stable_mosaic.version = 11 : i64} {
  func.func @_dist_partials_kernel(%arg0: i32, %arg1: i32, %arg2: memref<16x128xf32, #tpu.memory_space<vmem>>, %arg3: memref<16x128xf32, #tpu.memory_space<vmem>>, %arg4: memref<1x5x8x128xf32, #tpu.memory_space<vmem>>, %arg5: memref<1x8x1xf32, #tpu.memory_space<vmem>>) attributes {dimension_semantics = [#tpu.dimension_semantics<parallel>, #tpu.dimension_semantics<arbitrary>], iteration_bounds = array<i64: 2, 2>, scalar_prefetch = 0 : i64, scratch_operands = 0 : i64, tpu.core_type = #tpu.core_type<tc>, window_params = [{transform_indices = @transform_0, window_bounds = array<i64: 16, 128>}, {transform_indices = @transform_1, window_bounds = array<i64: 16, 128>}, {transform_indices = @transform_2, window_bounds = array<i64: 1, 5, 8, 128>}, {transform_indices = @transform_3, window_bounds = array<i64: 1, 8, 1>}]} {
    %c0_i32 = arith.constant 0 : i32
    %0 = arith.cmpi eq, %arg1, %c0_i32 : i32
    %1 = arith.extui %0 : i1 to i32
    %c0_i32_0 = arith.constant 0 : i32
    %2 = arith.cmpi ne, %1, %c0_i32_0 : i32
    scf.if %2 {
      %cst_61 = arith.constant 0.000000e+00 : f32
      %96 = vector.broadcast %cst_61 : f32 to vector<1x5x8x128xf32>
      %c0_62 = arith.constant 0 : index
      %c0_63 = arith.constant 0 : index
      %c0_64 = arith.constant 0 : index
      %c0_65 = arith.constant 0 : index
      %97 = vector.load %arg4[%c0_62, %c0_63, %c0_64, %c0_65] : memref<1x5x8x128xf32, #tpu.memory_space<vmem>>, vector<1x5x8x128xf32>
      tpu.vector_store %arg4[%c0_62, %c0_63, %c0_64, %c0_65], %96 {strides = array<i32>} : memref<1x5x8x128xf32, #tpu.memory_space<vmem>>, vector<1x5x8x128xf32>,
      %cst_66 = arith.constant 0.000000e+00 : f32
      %98 = vector.broadcast %cst_66 : f32 to vector<1x8x1xf32>
      %c0_67 = arith.constant 0 : index
      %c0_68 = arith.constant 0 : index
      %c0_69 = arith.constant 0 : index
      %99 = vector.load %arg5[%c0_67, %c0_68, %c0_69] : memref<1x8x1xf32, #tpu.memory_space<vmem>>, vector<1x8x1xf32>
      tpu.vector_store %arg5[%c0_67, %c0_68, %c0_69], %98 {strides = array<i32>} : memref<1x8x1xf32, #tpu.memory_space<vmem>>, vector<1x8x1xf32>,
    } else {
    }
    %c0 = arith.constant 0 : index
    %c0_1 = arith.constant 0 : index
    %3 = vector.load %arg2[%c0, %c0_1] : memref<16x128xf32, #tpu.memory_space<vmem>>, vector<16x128xf32>
    %c0_2 = arith.constant 0 : index
    %c0_3 = arith.constant 0 : index
    %4 = vector.load %arg3[%c0_2, %c0_3] : memref<16x128xf32, #tpu.memory_space<vmem>>, vector<16x128xf32>
    %cst = arith.constant dense<0xFF800000> : vector<16xf32>
    %5 = vector.multi_reduction <maximumf>, %3, %cst [1] : vector<16x128xf32> to vector<16xf32>
    %6 = vector.shape_cast %5 : vector<16xf32> to vector<16x1xf32>
    %7 = vector.broadcast %6 : vector<16x1xf32> to vector<16x128xf32>
    %8 = arith.subf %3, %7 : vector<16x128xf32>
    %cst_4 = arith.constant dense<0xFF800000> : vector<16xf32>
    %9 = vector.multi_reduction <maximumf>, %4, %cst_4 [1] : vector<16x128xf32> to vector<16xf32>
    %10 = vector.shape_cast %9 : vector<16xf32> to vector<16x1xf32>
    %11 = vector.broadcast %10 : vector<16x1xf32> to vector<16x128xf32>
    %12 = arith.subf %4, %11 : vector<16x128xf32>
    %13 = math.exp %8 : vector<16x128xf32>
    %14 = math.exp %12 : vector<16x128xf32>
    %cst_5 = arith.constant dense<0.000000e+00> : vector<16xf32>
    %15 = vector.multi_reduction <add>, %13, %cst_5 [1] : vector<16x128xf32> to vector<16xf32>
    %16 = vector.shape_cast %15 : vector<16xf32> to vector<16x1xf32>
    %17 = tpu.reciprocal %16 : vector<16x1xf32> -> vector<16x1xf32>
    %18 = vector.broadcast %17 : vector<16x1xf32> to vector<16x128xf32>
    %19 = arith.mulf %13, %18 : vector<16x128xf32>
    %cst_6 = arith.constant dense<0.000000e+00> : vector<16xf32>
    %20 = vector.multi_reduction <add>, %14, %cst_6 [1] : vector<16x128xf32> to vector<16xf32>
    %21 = vector.shape_cast %20 : vector<16xf32> to vector<16x1xf32>
    %22 = tpu.reciprocal %21 : vector<16x1xf32> -> vector<16x1xf32>
    %23 = vector.broadcast %22 : vector<16x1xf32> to vector<16x128xf32>
    %24 = arith.mulf %14, %23 : vector<16x128xf32>
    %cst_7 = arith.constant 7.812500e-03 : f32
    %25 = vector.broadcast %cst_7 : f32 to vector<16x128xf32>
    %26 = arith.subf %19, %25 : vector<16x128xf32>
    %cst_8 = arith.constant 7.812500e-03 : f32
    %27 = vector.broadcast %cst_8 : f32 to vector<16x128xf32>
    %28 = arith.subf %24, %27 : vector<16x128xf32>
    %29 = arith.mulf %26, %28 : vector<16x128xf32>
    %cst_9 = arith.constant dense<0.000000e+00> : vector<16xf32>
    %30 = vector.multi_reduction <add>, %29, %cst_9 [1] : vector<16x128xf32> to vector<16xf32>
    %31 = vector.shape_cast %30 : vector<16xf32> to vector<16x1xf32>
    %32 = arith.mulf %26, %26 : vector<16x128xf32>
    %cst_10 = arith.constant dense<0.000000e+00> : vector<16xf32>
    %33 = vector.multi_reduction <add>, %32, %cst_10 [1] : vector<16x128xf32> to vector<16xf32>
    %34 = vector.shape_cast %33 : vector<16xf32> to vector<16x1xf32>
    %35 = math.sqrt %34 : vector<16x1xf32>
    %36 = arith.mulf %28, %28 : vector<16x128xf32>
    %cst_11 = arith.constant dense<0.000000e+00> : vector<16xf32>
    %37 = vector.multi_reduction <add>, %36, %cst_11 [1] : vector<16x128xf32> to vector<16xf32>
    %38 = vector.shape_cast %37 : vector<16xf32> to vector<16x1xf32>
    %39 = math.sqrt %38 : vector<16x1xf32>
    %40 = arith.mulf %35, %39 : vector<16x1xf32>
    %cst_12 = arith.constant 9.99999993E-9 : f32
    %41 = vector.broadcast %cst_12 : f32 to vector<16x1xf32>
    %42 = arith.addf %40, %41 : vector<16x1xf32>
    %43 = tpu.reciprocal %42 : vector<16x1xf32> -> vector<16x1xf32>
    %44 = arith.mulf %31, %43 : vector<16x1xf32>
    %c0_13 = arith.constant 0 : index
    %c0_14 = arith.constant 0 : index
    %c0_15 = arith.constant 0 : index
    %45 = vector.load %arg5[%c0_13, %c0_14, %c0_15] : memref<1x8x1xf32, #tpu.memory_space<vmem>>, vector<1x8x1xf32>
    %46 = vector.shape_cast %45 : vector<1x8x1xf32> to vector<8x1xf32>
    %47 = vector.shape_cast %44 : vector<16x1xf32> to vector<2x8x1xf32>
    %cst_16 = arith.constant dense<0.000000e+00> : vector<8x1xf32>
    %48 = vector.multi_reduction <add>, %47, %cst_16 [0] : vector<2x8x1xf32> to vector<8x1xf32>
    %49 = arith.addf %46, %48 : vector<8x1xf32>
    %c0_17 = arith.constant 0 : index
    %c0_18 = arith.constant 0 : index
    %c0_19 = arith.constant 0 : index
    %50 = vector.load %arg5[%c0_17, %c0_18, %c0_19] : memref<1x8x1xf32, #tpu.memory_space<vmem>>, vector<1x8x1xf32>
    %51 = vector.shape_cast %50 : vector<1x8x1xf32> to vector<8x1xf32>
    %52 = vector.shape_cast %49 : vector<8x1xf32> to vector<1x8x1xf32>
    tpu.vector_store %arg5[%c0_17, %c0_18, %c0_19], %52 {strides = array<i32>} : memref<1x8x1xf32, #tpu.memory_space<vmem>>, vector<1x8x1xf32>,
    %c0_20 = arith.constant 0 : index
    %c0_21 = arith.constant 0 : index
    %c0_22 = arith.constant 0 : index
    %c0_23 = arith.constant 0 : index
    %53 = vector.load %arg4[%c0_20, %c0_21, %c0_22, %c0_23] : memref<1x5x8x128xf32, #tpu.memory_space<vmem>>, vector<1x1x8x128xf32>
    %54 = vector.shape_cast %53 : vector<1x1x8x128xf32> to vector<8x128xf32>
    %55 = vector.shape_cast %26 : vector<16x128xf32> to vector<2x8x128xf32>
    %cst_24 = arith.constant dense<0.000000e+00> : vector<8x128xf32>
    %56 = vector.multi_reduction <add>, %55, %cst_24 [0] : vector<2x8x128xf32> to vector<8x128xf32>
    %57 = arith.addf %54, %56 : vector<8x128xf32>
    %c0_25 = arith.constant 0 : index
    %c0_26 = arith.constant 0 : index
    %c0_27 = arith.constant 0 : index
    %c0_28 = arith.constant 0 : index
    %58 = vector.load %arg4[%c0_25, %c0_26, %c0_27, %c0_28] : memref<1x5x8x128xf32, #tpu.memory_space<vmem>>, vector<1x1x8x128xf32>
    %59 = vector.shape_cast %58 : vector<1x1x8x128xf32> to vector<8x128xf32>
    %60 = vector.shape_cast %57 : vector<8x128xf32> to vector<1x1x8x128xf32>
    tpu.vector_store %arg4[%c0_25, %c0_26, %c0_27, %c0_28], %60 {strides = array<i32>} : memref<1x5x8x128xf32, #tpu.memory_space<vmem>>, vector<1x1x8x128xf32>,
    %c0_29 = arith.constant 0 : index
    %c1 = arith.constant 1 : index
    %c0_30 = arith.constant 0 : index
    %c0_31 = arith.constant 0 : index
    %61 = vector.load %arg4[%c0_29, %c1, %c0_30, %c0_31] : memref<1x5x8x128xf32, #tpu.memory_space<vmem>>, vector<1x1x8x128xf32>
    %62 = vector.shape_cast %61 : vector<1x1x8x128xf32> to vector<8x128xf32>
    %63 = vector.shape_cast %28 : vector<16x128xf32> to vector<2x8x128xf32>
    %cst_32 = arith.constant dense<0.000000e+00> : vector<8x128xf32>
    %64 = vector.multi_reduction <add>, %63, %cst_32 [0] : vector<2x8x128xf32> to vector<8x128xf32>
    %65 = arith.addf %62, %64 : vector<8x128xf32>
    %c0_33 = arith.constant 0 : index
    %c1_34 = arith.constant 1 : index
    %c0_35 = arith.constant 0 : index
    %c0_36 = arith.constant 0 : index
    %66 = vector.load %arg4[%c0_33, %c1_34, %c0_35, %c0_36] : memref<1x5x8x128xf32, #tpu.memory_space<vmem>>, vector<1x1x8x128xf32>
    %67 = vector.shape_cast %66 : vector<1x1x8x128xf32> to vector<8x128xf32>
    %68 = vector.shape_cast %65 : vector<8x128xf32> to vector<1x1x8x128xf32>
    tpu.vector_store %arg4[%c0_33, %c1_34, %c0_35, %c0_36], %68 {strides = array<i32>} : memref<1x5x8x128xf32, #tpu.memory_space<vmem>>, vector<1x1x8x128xf32>,
    %c0_37 = arith.constant 0 : index
    %c2 = arith.constant 2 : index
    %c0_38 = arith.constant 0 : index
    %c0_39 = arith.constant 0 : index
    %69 = vector.load %arg4[%c0_37, %c2, %c0_38, %c0_39] : memref<1x5x8x128xf32, #tpu.memory_space<vmem>>, vector<1x1x8x128xf32>
    %70 = vector.shape_cast %69 : vector<1x1x8x128xf32> to vector<8x128xf32>
    %71 = arith.mulf %26, %26 : vector<16x128xf32>
    %72 = vector.shape_cast %71 : vector<16x128xf32> to vector<2x8x128xf32>
    %cst_40 = arith.constant dense<0.000000e+00> : vector<8x128xf32>
    %73 = vector.multi_reduction <add>, %72, %cst_40 [0] : vector<2x8x128xf32> to vector<8x128xf32>
    %74 = arith.addf %70, %73 : vector<8x128xf32>
    %c0_41 = arith.constant 0 : index
    %c2_42 = arith.constant 2 : index
    %c0_43 = arith.constant 0 : index
    %c0_44 = arith.constant 0 : index
    %75 = vector.load %arg4[%c0_41, %c2_42, %c0_43, %c0_44] : memref<1x5x8x128xf32, #tpu.memory_space<vmem>>, vector<1x1x8x128xf32>
    %76 = vector.shape_cast %75 : vector<1x1x8x128xf32> to vector<8x128xf32>
    %77 = vector.shape_cast %74 : vector<8x128xf32> to vector<1x1x8x128xf32>
    tpu.vector_store %arg4[%c0_41, %c2_42, %c0_43, %c0_44], %77 {strides = array<i32>} : memref<1x5x8x128xf32, #tpu.memory_space<vmem>>, vector<1x1x8x128xf32>,
    %c0_45 = arith.constant 0 : index
    %c3 = arith.constant 3 : index
    %c0_46 = arith.constant 0 : index
    %c0_47 = arith.constant 0 : index
    %78 = vector.load %arg4[%c0_45, %c3, %c0_46, %c0_47] : memref<1x5x8x128xf32, #tpu.memory_space<vmem>>, vector<1x1x8x128xf32>
    %79 = vector.shape_cast %78 : vector<1x1x8x128xf32> to vector<8x128xf32>
    %80 = arith.mulf %28, %28 : vector<16x128xf32>
    %81 = vector.shape_cast %80 : vector<16x128xf32> to vector<2x8x128xf32>
    %cst_48 = arith.constant dense<0.000000e+00> : vector<8x128xf32>
    %82 = vector.multi_reduction <add>, %81, %cst_48 [0] : vector<2x8x128xf32> to vector<8x128xf32>
    %83 = arith.addf %79, %82 : vector<8x128xf32>
    %c0_49 = arith.constant 0 : index
    %c3_50 = arith.constant 3 : index
    %c0_51 = arith.constant 0 : index
    %c0_52 = arith.constant 0 : index
    %84 = vector.load %arg4[%c0_49, %c3_50, %c0_51, %c0_52] : memref<1x5x8x128xf32, #tpu.memory_space<vmem>>, vector<1x1x8x128xf32>
    %85 = vector.shape_cast %84 : vector<1x1x8x128xf32> to vector<8x128xf32>
    %86 = vector.shape_cast %83 : vector<8x128xf32> to vector<1x1x8x128xf32>
    tpu.vector_store %arg4[%c0_49, %c3_50, %c0_51, %c0_52], %86 {strides = array<i32>} : memref<1x5x8x128xf32, #tpu.memory_space<vmem>>, vector<1x1x8x128xf32>,
    %c0_53 = arith.constant 0 : index
    %c4 = arith.constant 4 : index
    %c0_54 = arith.constant 0 : index
    %c0_55 = arith.constant 0 : index
    %87 = vector.load %arg4[%c0_53, %c4, %c0_54, %c0_55] : memref<1x5x8x128xf32, #tpu.memory_space<vmem>>, vector<1x1x8x128xf32>
    %88 = vector.shape_cast %87 : vector<1x1x8x128xf32> to vector<8x128xf32>
    %89 = arith.mulf %26, %28 : vector<16x128xf32>
    %90 = vector.shape_cast %89 : vector<16x128xf32> to vector<2x8x128xf32>
    %cst_56 = arith.constant dense<0.000000e+00> : vector<8x128xf32>
    %91 = vector.multi_reduction <add>, %90, %cst_56 [0] : vector<2x8x128xf32> to vector<8x128xf32>
    %92 = arith.addf %88, %91 : vector<8x128xf32>
    %c0_57 = arith.constant 0 : index
    %c4_58 = arith.constant 4 : index
    %c0_59 = arith.constant 0 : index
    %c0_60 = arith.constant 0 : index
    %93 = vector.load %arg4[%c0_57, %c4_58, %c0_59, %c0_60] : memref<1x5x8x128xf32, #tpu.memory_space<vmem>>, vector<1x1x8x128xf32>
    %94 = vector.shape_cast %93 : vector<1x1x8x128xf32> to vector<8x128xf32>
    %95 = vector.shape_cast %92 : vector<8x128xf32> to vector<1x1x8x128xf32>
    tpu.vector_store %arg4[%c0_57, %c4_58, %c0_59, %c0_60], %95 {strides = array<i32>} : memref<1x5x8x128xf32, #tpu.memory_space<vmem>>, vector<1x1x8x128xf32>,
    return
  }
  func.func @transform_0(%arg0: i32, %arg1: i32) -> (i32, i32) {
    %c2_i32 = arith.constant 2 : i32
    %0 = arith.muli %arg0, %c2_i32 : i32
    %1 = arith.addi %0, %arg1 : i32
    %c3_i32 = arith.constant 3 : i32
    %2 = arith.minsi %1, %c3_i32 : i32
    %c0_i32 = arith.constant 0 : i32
    %c0_i32_0 = arith.constant 0 : i32
    return %2, %c0_i32 : i32, i32
  }
  func.func @transform_1(%arg0: i32, %arg1: i32) -> (i32, i32) {
    %c2_i32 = arith.constant 2 : i32
    %0 = arith.muli %arg0, %c2_i32 : i32
    %1 = arith.addi %0, %arg1 : i32
    %c3_i32 = arith.constant 3 : i32
    %2 = arith.minsi %1, %c3_i32 : i32
    %c0_i32 = arith.constant 0 : i32
    %c0_i32_0 = arith.constant 0 : i32
    return %2, %c0_i32 : i32, i32
  }
  func.func @transform_2(%arg0: i32, %arg1: i32) -> (i32, i32, i32, i32) {
    %c0_i32 = arith.constant 0 : i32
    %c0_i32_0 = arith.constant 0 : i32
    %c0_i32_1 = arith.constant 0 : i32
    %c0_i32_2 = arith.constant 0 : i32
    return %arg0, %c0_i32, %c0_i32_0, %c0_i32_1 : i32, i32, i32, i32
  }
  func.func @transform_3(%arg0: i32, %arg1: i32) -> (i32, i32, i32) {
    %c0_i32 = arith.constant 0 : i32
    %c0_i32_0 = arith.constant 0 : i32
    %c0_i32_1 = arith.constant 0 : i32
    return %arg0, %c0_i32, %c0_i32_0 : i32, i32, i32
  }
}

</mosaic_0001>

<bundles_post_ra>
// kernel: tpu_custom_call.1
= control target key start
LH: loop header
LB: loop body
LE: loop exit
PB: predicated region body
PF: predicated region fallthrough
CT: control target
= control target key end

     0   :  { %s1298_s0 = inlined_call_operand.hbm [shape: f32[64,128], index: 0, kind: input, shape index: {}]   ;;  %s1299_s1 = inlined_call_operand.hbm [shape: f32[64,128], index: 1, kind: input, shape index: {}]   ;;  %s1300_s2 = inlined_call_operand.hbm [shape: f32[2,5,8,128], index: 2, kind: output, shape index: {0}]   ;;  %s1301_s3 = inlined_call_operand.vmem [shape: f32[2,8,1], index: 3, kind: output, shape index: {1}]  }
   0x1   :  { %1310 = sst [smem:[#allocation16_spill]] %s1298_s0 }
   0x2   :  { %9 = vsyncpa [#allocation3], 0 }
   0x3   :  { %11 = vsyncpa [#allocation3 + $0x1], 0 }
   0x4   :  { %12 = vsyncpa [#allocation6], 0 }
   0x5   :  { %14 = vsyncpa [#allocation6 + $0x1], 0 }
   0x6   :  { %15 = vsyncpa [#allocation4], 0 }
   0x7   :  { %17 = vsyncpa [#allocation4 + $0x1], 0  ;;  %s972_s12 = smov 0   ;;  %s974_s13 = smov 0  }
   0x8   :  { %s976_s14 = smov 0   ;;  %s978_s15 = smov 0  }
   0x9   :  { %s980_s16 = smov 0   ;;  %s982_s17 = smov 0  }
   0xa   :  { %s984_s18 = smov 0   ;;  %s986_s19 = smov 0  }
   0xb   :  { %s988_s20 = smov 0   ;;  %s990_s21 = smov 0  }
   0xc   :  { %s992_s22 = smov 0  }
   0xd LB: > { %1311 = sst [smem:[#allocation11_spill]] %s934_s20  ;;  %s576_s23 = sadd.s32 4294967295, %s942_s22   ;;  %s942_s22 = sphi %s992_s22, %s23_s22   ;;  %s938_s21 = sphi %s990_s21, %s1333_s21   ;;  %s934_s20 = sphi %s988_s20, %s1340_s20   ;;  %s930_s19 = sphi %s986_s19, %s1331_s19   ;;  %s926_s18 = sphi %s984_s18, %s1330_s18   ;;  %s922_s17 = sphi %s982_s17, %s1339_s17   ;;  %s918_s16 = sphi %s980_s16, %s1338_s16   ;;  %s914_s15 = sphi %s978_s15, %s1337_s15   ;;  %s910_s14 = sphi %s976_s14, %s1336_s14   ;;  %s906_s13 = sphi %s974_s13, %s1335_s13   ;;  %s902_s12 = sphi %s972_s12, %s1334_s12  }
   0xe   : > { %1312 = sst [smem:[#allocation12_spill]] %s938_s21  ;;  %s577_s24 = sadd.s32 4294967294, %s942_s22  }
   0xf   : > { %s32_s25 = sadd.s32 1, %s934_s20  ;;  %s35_s26 = sadd.s32 1, %s938_s21 }
  0x10   : > { %p33_p0 = scmp.ge.s32.totalorder %s32_s25, 2  ;;  %s578_s27 = sshll.u32 %s938_s21, 1 }
  0x11   : > { %s40_s28 = sadd.s32 %s934_s20, %s578_s27  ;;  %s50_s29 = sadd.s32 1, %s922_s17 }
  0x12   : > { %s1342_s25 = smov (%p33_p0, %s32_s25), 0  ;;  %s1344_s26 = smov (!%p33_p0, %s35_s26), %s938_s21 }
  0x13   : > { %1313 = sst [smem:[#allocation13_spill]] %s1342_s25  ;;  %p41_p1 = scmp.lt.s32.totalorder %s40_s28, 3 }
  0x14   : > { %p57_p2 = scmp.ne.s32.totalorder %s922_s17, %s918_s16  ;;  %p37_p3 = scmp.ge.s32.totalorder %s1344_s26, 2 }
  0x15   : > { %p58_p4 = scmp.eq.s32.totalorder %s942_s22, 0  ;;  %s1346_s28 = smov (!%p41_p1, %s40_s28), 3 }
  0x16   : > { %s1348_s26 = smov (%p37_p3, %s1344_s26), 0  ;;  %p63_p6 = scmp.ne.s32.totalorder %s918_s16, %s914_s15 }
  0x17   : > { %1314 = sst [smem:[#allocation14_spill]] %s1348_s26  ;;  %p1044_p5 = por %p58_p4, %p57_p2 }
  0x18   : > { %s579_s4 = sshll.u32 %s1348_s26, 1  ;;  %p64_p7 = scmp.eq.s32.totalorder %s576_s23, 0 }
  0x19   : > { %s44_s5 = sadd.s32 %s579_s4, %s1342_s25  ;;  %s107_s6 = ssub.s32 %s938_s21, %s1348_s26 }
  0x1a   : > { %p45_p8 = scmp.lt.s32.totalorder %s44_s5, 3  ;;  %p1056_p9 = por %p64_p7, %p63_p6 }
  0x1b   : > { %p108_p10 = scmp.eq.s32.totalorder %s107_s6, 0  ;;  %s110_s8 = sadd.s32 1, %s910_s14 }
  0x1c   : > { %s1316_s7 = scalar_select %p1056_p9, 1, 0 }
  0x1d   : > { %s1350_s5 = smov (!%p45_p8, %s44_s5), 3  ;;  %p120_p11 = scmp.ne.s32.totalorder %s910_s14, %s906_s13 }
  0x1e   : > { %s1062_s9 = scalar_select %p108_p10, %s910_s14, %s110_s8  }
  0x1f   : > { %s47_s10 = ssub.s32 %s1346_s28, %s1350_s5  ;;  %p121_p13 = scmp.eq.s32.totalorder %s576_s23, 3 }
  0x20   : > { %p48_p12 = scmp.eq.s32.totalorder %s47_s10, 0  ;;  %p126_p0 = scmp.ne.s32.totalorder %s906_s13, %s902_s12 }
  0x21   : > { %p127_p1 = scmp.eq.s32.totalorder %s577_s24, 3  ;;  %p1076_p2 = por %p121_p13, %p120_p11 }
  0x22   : > { %s1074_s11 = scalar_select %p48_p12, %s922_s17, %s50_s29  }
  0x23   : > { %s1318_s15 = scalar_select %p1076_p2, 1, 0 }
  0x24   : > { %1317 = sst [smem:[#allocation15_spill]] %s1074_s11  ;;  %p1080_p3 = por %p127_p1, %p126_p0 }
  0x25   : > { %p633_p4 = scmp.lt.s32.totalorder %s942_s22, 4  ;;  %s1086_s4 = sand.u32 1, %s922_s17  }
  0x26   : > { %s1319_s27 = scalar_select %p1080_p3, 1, 0 }
  0x27   : > { %s1305_s23 = sshll.u32 %s1346_s28, 8  ;;  %s1304_s5 = sshll.u32 %s1086_s4, 4 }
  0x28   : > { %s1320_s0 = sld [smem:[#allocation16_spill]]  ;;  %s177_s8 = scalar_lea.vmem [#allocation2], %s1304_s5 }
  0x29   : > { %s188_s10 = sshll.u32 %s177_s8, 4  ;;  %p1101_p6 = pnand %p633_p4, %p1044_p5  ;;  %s1105_s10 = int_to_ptr.vmem [resolvable:$true] %s188_s10 }
  0x2b   : > { %p758_p8 = pneg %p1101_p6 }
  0x2e   : > { %s1095_s6 = scalar_lea.hbm %s1320_s0, %s1305_s23  ;;  %s761_s30 = scalar_lea.hbm %s1320_s0, 1024 }
  0x2f   : > { %s756_s24 = scalar_lea.hbm %s1095_s6, 256  ;;  %p762_p5 = scmp.lt.u32.totalorder %s1095_s6, %s1320_s0 }
  0x30   : > { %p757_p7 = scmp.ne.s32.totalorder %s1095_s6, %s756_s24  ;;  %p763_p12 = scmp.lt.u32.totalorder %s761_s30, %s756_s24 }
  0x31   : > { %p765_p0 = scmp.lt.u32.totalorder %s756_s24, %s1095_s6 }
  0x32   : > { %p759_p10 = pnand %p758_p8, %p757_p7  ;;  %p764_p13 = por %p763_p12, %p762_p5 }
  0x34   : > { %p760_p11 = pneg %p759_p10  ;;  %p766_p1 = por %p765_p0, %p764_p13 }
  0x36   : > { %p767_p4 = pnand %p766_p1, %p760_p11 }
  0x38   : > { %770 = shalt.err (!%p767_p4)
}
  0x39   : > { %s771_s25 = scalar_lea.vmem %s1105_s10, 256  ;;  %s944_s29 = smov [#allocation2]  }
  0x3a   : > { %p772_p7 = scmp.ne.s32.totalorder %s1105_s10, %s771_s25  ;;  %s776_s8 = sshll.u32 %s944_s29, 4  ;;  %s777_s8 = int_to_ptr.vmem [resolvable:$false] %s776_s8 }
  0x3b   : > { %s778_s23 = scalar_lea.vmem %s777_s8, 512  ;;  %p779_p2 = scmp.lt.s32.totalorder %s1105_s10, %s777_s8 }
  0x3c   : > { %p774_p10 = pnand %p772_p7, %p758_p8  ;;  %p780_p5 = scmp.lt.s32.totalorder %s778_s23, %s771_s25 }
  0x3e   : > { %p775_p3 = pneg %p774_p10  ;;  %p781_p12 = por %p780_p5, %p779_p2 }
  0x40   : > { %p782_p13 = pnand %p781_p12, %p775_p3 }
  0x42   : > { %785 = shalt.err (!%p782_p13)
}
  0x43   : > { %s945_s5 = smov 128   ;;  %s946_s24 = smov 8  }
  0x44   : > { %s1322_s25 = scalar_lea.sflag [#allocation3], %s1086_s4  ;;  %p592_p2 = scmp.ge.s32.totalorder %s942_s22, 1 }
  0x45   : > { %625 = dma.hbm_to_vmem [thread:$0]  (!%p1101_p6), %s1095_s6, 256, %s1105_s10, %s1322_s25, %s945_s5, %s945_s5, %s946_s24  }
  0x46   : > { %p221_p3 = scmp.lt.s32.totalorder %s942_s22, 5  ;;  %s1324_s29 = sshll.u32 %s1346_s28, 8 }
  0x47   : > { %s1149_s0 = scalar_lea.hbm %s1299_s1, %s1324_s29  ;;  %s1325_s21 = sshll.u32 %s1086_s4, 4 }
  0x48   : > { %p1140_p11 = pnand %p592_p2, %p221_p3  ;;  %s202_s20 = scalar_lea.vmem [#allocation5], %s1325_s21 }
  0x49   : > { %s213_s11 = sshll.u32 %s202_s20, 4  ;;  %s199_s6 = scalar_lea.sflag [#allocation6], %s1086_s4  ;;  %s1153_s11 = int_to_ptr.vmem [resolvable:$true] %s213_s11 }
  0x4a   : > { %s786_s10 = scalar_lea.hbm %s1149_s0, 256  ;;  %s791_s29 = scalar_lea.hbm %s1299_s1, 1024 }
  0x4b   : > { %p787_p0 = scmp.ne.s32.totalorder %s1149_s0, %s786_s10  ;;  %p792_p7 = scmp.lt.u32.totalorder %s1149_s0, %s1299_s1 }
  0x4c   : > { %p793_p10 = scmp.lt.u32.totalorder %s791_s29, %s786_s10  ;;  %p795_p12 = scmp.lt.u32.totalorder %s786_s10, %s1149_s0 }
  0x4d   : > { %p789_p1 = pnand %p787_p0, %p758_p8 }
  0x4e   : > { %p794_p5 = por %p793_p10, %p792_p7 }
  0x4f   : > { %p790_p4 = pneg %p789_p1 }
  0x50   : > { %p796_p13 = por %p795_p12, %p794_p5 }
  0x52   : > { %p797_p2 = pnand %p796_p13, %p790_p4 }
  0x54   : > { %800 = shalt.err (!%p797_p2)
}
  0x55   : > { %s801_s20 = scalar_lea.vmem %s1153_s11, 256  ;;  %s947_s21 = smov [#allocation5]  }
  0x56   : > { %p802_p3 = scmp.ne.s32.totalorder %s1153_s11, %s801_s20  ;;  %s806_s28 = sshll.u32 %s947_s21, 4  ;;  %s807_s28 = int_to_ptr.vmem [resolvable:$false] %s806_s28 }
  0x57   : > { %s808_s25 = scalar_lea.vmem %s807_s28, 512  ;;  %p809_p9 = scmp.lt.s32.totalorder %s1153_s11, %s807_s28 }
  0x58   : > { %p804_p0 = pnand %p802_p3, %p758_p8  ;;  %p810_p7 = scmp.lt.s32.totalorder %s808_s25, %s801_s20 }
  0x5a   : > { %p805_p1 = pneg %p804_p0  ;;  %p811_p10 = por %p810_p7, %p809_p9 }
  0x5c   : > { %p812_p5 = pnand %p811_p10, %p805_p1 }
  0x5e   : > { %815 = shalt.err (!%p812_p5)
}
  0x5f   : > { %628 = dma.hbm_to_vmem [thread:$0]  (!%p1101_p6), %s1149_s0, 256, %s1153_s11, %s199_s6, %s945_s5, %s945_s5, %s946_s24  }
  0x60   : > { %225 = sbr.rel (%p1140_p11) target bundleno = 620 (0x26c), region = 28  ;;  %s227_s10 = sand.u32 (!%p1140_p11), 1, %s918_s16  }
  0x61   : > { %s593_s29 = sshll.u32 (!%p1140_p11), %s227_s10, 4  ;;  %s228_s8 = scalar_lea.sflag (!%p1140_p11), [#allocation3], %s227_s10 }
  0x62   : > { %s231_s23 = scalar_lea.vmem (!%p1140_p11), [#allocation2], %s593_s29  ;;  %p1326_p9 = scmp.ne.s32.totalorder (!%p1140_p11), %s1316_s7, 0 }
  0x67   : > { %889 = dma.done.wait (%p1326_p9), %s228_s8, 256  }
  0x68   : > { %891 = vsyncadd (%p1326_p9), %s228_s8, 4294967040  ;;  %s237_s26 = scalar_lea.sflag [#allocation6], %s227_s10  ;;  %s240_s4 = scalar_lea.vmem [#allocation5], %s593_s29 }
  0x69   : > { %893 = dma.done.wait (%p1326_p9), %s237_s26, 256  }
  0x6a   : > { %895 = vsyncadd (%p1326_p9), %s237_s26, 4294967040  ;;  %s263_s0 = sand.u32 1, %s906_s13   ;;  %p282_p6 = scmp.lt.s32.totalorder %s930_s19, 1 }
  0x6b   : > { %s614_s11 = smul.u32 40, %s263_s0  ;;  %p596_p8 = scmp.ne.s32.totalorder %s926_s18, 0 }
  0x6c   : > { %s283_s5 = scalar_select %p282_p6, %s930_s19, 1 }
  0x6d   : > { %s1205_s21 = scalar_lea.vmem [#allocation7], %s614_s11  ;;  %289 = sbr.rel (%p596_p8) target bundleno = 116 (0x74), region = 40  ;;  %vm295_vm0 = vcmask (!%p596_p8), 7168   ;;  %v948_v0 = vmov (!%p596_p8), 0.0  }
  0x6e   : > { %s595_s24 = sshll.u32 %s283_s5, 3  ;;  %290 = vst [vmem:[%s1205_s21] sm:$0xff] (!%p596_p8), %v948_v0  ;;  %291 = vst [vmem:[%s1205_s21 + $0x8] sm:$0xff] (!%p596_p8), %v948_v0 }
  0x6f   : > { %s1203_s20 = scalar_lea.vmem %s1301_s3, %s595_s24  ;;  %292 = vst [vmem:[%s1205_s21 + $0x10] sm:$0xff] (!%p596_p8), %v948_v0  ;;  %293 = vst [vmem:[%s1205_s21 + $0x18] sm:$0xff] (!%p596_p8), %v948_v0 }
  0x70   : > { %294 = vst [vmem:[%s1205_s21 + $0x20] sm:$0xff] (!%p596_p8), %v948_v0  ;;  %296 = vst.msk [vmem:[%s1203_s20] sm:$0xff] (!%p596_p8), %vm295_vm0, %v948_v0 }
  0x74 PF: > { %v297_v1 = vld [vmem:[%s231_s23] sm:$0xff]  ;;  %v298_v3 = vld [vmem:[%s231_s23 + $0x8] sm:$0xff]  ;;  %s615_s18 = smul.u32 640, %s930_s19  ;;  %s442_s7 = sshll.u32 %s1205_s21, 4  ;;  %s1231_s7 = int_to_ptr.vmem [resolvable:$true] %s442_s7 }
  0x75   : > { %v299_v2 = vld [vmem:[%s240_s4] sm:$0xff]  ;;  %301 = vmax.xlane.f32.xlu0 %v297_v1  ;;  %v300_v4 = vld [vmem:[%s240_s4 + $0x8] sm:$0xff]  ;;  %s1235_s29 = scalar_lea.sflag [#allocation4], %s263_s0  ;;  %s816_s8 = scalar_lea.vmem %s1231_s7, 640 }
  0x76   : > { %307 = vmax.xlane.f32.xlu1 %v299_v2  ;;  %v400_v35 = vld [vmem:[%s1205_s21] sm:$0xff]  ;;  %v603_v40 = vld [vmem:[%s1205_s21 + $0x10] sm:$0xff]  ;;  %v601_v45 = vld [vmem:[%s1205_s21 + $0x8] sm:$0xff]  ;;  %s1229_s10 = scalar_lea.hbm %s1300_s2, %s615_s18  ;;  %p817_p11 = scmp.ne.s32.totalorder %s1231_s7, %s816_s8 }
  0x77   : > { %v605_v51 = vld [vmem:[%s1205_s21 + $0x18] sm:$0xff]  ;;  %v607_v52 = vld [vmem:[%s1205_s21 + $0x20] sm:$0xff]  ;;  %p1327_p4 = scmp.ne.s32.totalorder %s1318_s15, 0  ;;  %s949_s19 = smov [#allocation7]  }
  0x78   : > { %s820_s23 = sshll.u32 %s949_s19, 4  ;;  %s821_s23 = int_to_ptr.vmem [resolvable:$false] %s820_s23 }
  0x79   : > { %303 = vmax.xlane.f32.xlu0 %v298_v3  ;;  %p818_p12 = pnand %p817_p11, %p1327_p4  ;;  %s822_s26 = scalar_lea.vmem %s821_s23, 1280 }
  0x7a   : > { %309 = vmax.xlane.f32.xlu1 %v300_v4  ;;  %p823_p2 = scmp.lt.s32.totalorder %s1231_s7, %s821_s23  ;;  %p824_p3 = scmp.lt.s32.totalorder %s822_s26, %s816_s8 }
  0x7b   : > { %p819_p13 = pneg %p818_p12 }
  0x7c   : > { %p825_p0 = por %p824_p3, %p823_p2 }
  0x7e   : > { %p826_p1 = pnand %p825_p0, %p819_p13 }
 0x102   : > { %v302_v5 = vpop.xlane.xlu0 %301 }
 0x103   : > { %v308_v6 = vpop.xlane.xlu1 %307  ;;  %v305_v7 = vsub.f32 %v297_v1, %v302_v5 }
 0x104   : > { %v311_v8 = vsub.f32 %v299_v2, %v308_v6 }
 0x105   : > { %v313_v9 = vmul.f32 1.442695, %v305_v7 }
 0x106   : > { %v317_v10 = vmul.f32 1.442695, %v311_v8  ;;  %v304_v11 = vpop.xlane.xlu0 %303 }
 0x107   : > { %v310_v12 = vpop.xlane.xlu1 %309  ;;  %728 = vpow2.f32 %v313_v9  ;;  %v306_v13 = vsub.f32 %v298_v3, %v304_v11 }
 0x108   : > { %v312_v14 = vsub.f32 %v300_v4, %v310_v12  ;;  %730 = vpow2.f32 %v317_v10 }
 0x109   : > { %v315_v15 = vmul.f32 1.442695, %v306_v13 }
 0x10a   : > { %v319_v16 = vmul.f32 1.442695, %v312_v14 }
 0x10b   : > { %732 = vpow2.f32 %v315_v15 }
 0x10c   : > { %734 = vpow2.f32 %v319_v16 }
 0x111   : > { %v729_v17 = vpop.eup %728 }
 0x112   : > { %321 = vadd.xlane.f32.xlu0 %v729_v17  ;;  %v731_v18 = vpop.eup %730 }
 0x115   : > { %v733_v19 = vpop.eup %732 }
 0x116   : > { %329 = vadd.xlane.f32.xlu0 %v731_v18  ;;  %323 = vadd.xlane.f32.xlu1 %v733_v19  ;;  %v735_v20 = vpop.eup %734 }
 0x11a   : > { %331 = vadd.xlane.f32.xlu1 %v735_v20 }
 0x19f   : > { %v322_v21 = vpop.xlane.xlu0 %321 }
 0x1a0   : > { %736 = vrcp.f32 %v322_v21 }
 0x1a3   : > { %v324_v22 = vpop.xlane.xlu1 %323  ;;  %v330_v23 = vpop.xlane.xlu0 %329 }
 0x1a4   : > { %738 = vrcp.f32 %v324_v22 }
 0x1a5   : > { %740 = vrcp.f32 %v330_v23 }
 0x1a7   : > { %v332_v24 = vpop.xlane.xlu1 %331 }
 0x1a8   : > { %742 = vrcp.f32 %v332_v24 }
 0x1aa   : > { %v737_v25 = vpop.eup %736 }
 0x1ab   : > { %v327_v26 = vmul.f32 %v737_v25, %v729_v17 }
 0x1ad   : > { %v597_v27 = vadd.f32 -0.0078125, %v327_v26 }
 0x1ae   : > { %v739_v28 = vpop.eup %738 }
 0x1af   : > { %v741_v29 = vpop.eup %740  ;;  %v347_v30 = vmul.f32 %v597_v27, %v597_v27  ;;  %v328_v31 = vmul.f32 %v739_v28, %v733_v19 }
 0x1b0   : > { %v335_v32 = vmul.f32 %v741_v29, %v731_v18 }
 0x1b1   : > { %349 = vadd.xlane.f32.xlu0 %v347_v30  ;;  %v598_v33 = vadd.f32 -0.0078125, %v328_v31 }
 0x1b2   : > { %v743_v34 = vpop.eup %742  ;;  %v599_v36 = vadd.f32 -0.0078125, %v335_v32 }
 0x1b3   : > { %v348_v37 = vmul.f32 %v598_v33, %v598_v33  ;;  %v401_v38 = vadd.f32 %v598_v33, %v597_v27  ;;  %v336_v39 = vmul.f32 %v743_v34, %v735_v20 }
 0x1b4   : > { %v367_v41 = vmul.f32 %v599_v36, %v599_v36  ;;  %v341_v46 = vmul.f32 %v599_v36, %v597_v27 }
 0x1b5   : > { %351 = vadd.xlane.f32.xlu1 %v348_v37  ;;  %v402_v42 = vadd.f32 %v401_v38, %v400_v35  ;;  %v411_v43 = vadd.f32 %v348_v37, %v347_v30  ;;  %v600_v44 = vadd.f32 -0.0078125, %v336_v39 }
 0x1b6   : > { %369 = vadd.xlane.f32.xlu0 %v367_v41 }
 0x1b7   : > { %403 = vst [vmem:[%s1205_s21] sm:$0xff] %v402_v42  ;;  %v412_v47 = vadd.f32 %v603_v40, %v411_v43  ;;  %v368_v48 = vmul.f32 %v600_v44, %v600_v44  ;;  %v406_v49 = vadd.f32 %v600_v44, %v599_v36  ;;  %v342_v50 = vmul.f32 %v600_v44, %v598_v33 }
 0x1b9   : > { %604 = vst [vmem:[%s1205_s21 + $0x10] sm:$0xff] %v412_v47  ;;  %371 = vadd.xlane.f32.xlu1 %v368_v48  ;;  %v407_v53 = vadd.f32 %v601_v45, %v406_v49  ;;  %v416_v54 = vadd.f32 %v368_v48, %v367_v41  ;;  %v421_v55 = vadd.f32 %v342_v50, %v341_v46 }
 0x1ba   : > { %343 = vadd.xlane.f32.xlu0 %v341_v46 }
 0x1bb   : > { %602 = vst [vmem:[%s1205_s21 + $0x8] sm:$0xff] %v407_v53  ;;  %v417_v56 = vadd.f32 %v605_v51, %v416_v54  ;;  %v422_v57 = vadd.f32 %v607_v52, %v421_v55 }
 0x1bd   : > { %606 = vst [vmem:[%s1205_s21 + $0x18] sm:$0xff] %v417_v56  ;;  %345 = vadd.xlane.f32.xlu1 %v342_v50  ;;  %608 = vst [vmem:[%s1205_s21 + $0x20] sm:$0xff] %v422_v57 }
 0x1be   : > { %829 = shalt.err (!%p826_p1)
}
 0x1bf   : > { %s830_s4 = scalar_lea.hbm %s1229_s10, 640  ;;  %s834_s5 = scalar_lea.hbm %s1300_s2, 1280 }
 0x1c0   : > { %p831_p7 = scmp.ne.s32.totalorder %s1229_s10, %s830_s4  ;;  %p835_p9 = scmp.lt.u32.totalorder %s1229_s10, %s1300_s2 }
 0x1c1   : > { %p836_p6 = scmp.lt.u32.totalorder %s834_s5, %s830_s4  ;;  %p838_p11 = scmp.lt.u32.totalorder %s830_s4, %s1229_s10 }
 0x1c2   : > { %p832_p10 = pnand %p831_p7, %p1327_p4 }
 0x1c3   : > { %p837_p8 = por %p836_p6, %p835_p9 }
 0x1c4   : > { %p833_p5 = pneg %p832_p10 }
 0x1c5   : > { %p839_p12 = por %p838_p11, %p837_p8 }
 0x1c7   : > { %p840_p13 = pnand %p839_p12, %p833_p5 }
 0x1c9   : > { %843 = shalt.err (!%p840_p13)
}
 0x1ca   : > { %s950_s6 = smov 128   ;;  %s951_s21 = smov 8   ;;  %v395_v28 = vld [vmem:[%s1203_s20] sm:$0xff]  ;;  %vm398_vm9 = vcmask 7168  }
 0x1cb   : > { %620 = dma.vmem_to_hbm [thread:$0]  (%p1327_p4), %s1231_s7, 640, %s1229_s10, %s1235_s29, %s950_s6, %s950_s6, %s951_s21  }
 0x23e   : > { %v350_v58 = vpop.xlane.xlu0 %349 }
 0x23f   : > { %744 = vrsqrt.f32 %v350_v58  ;;  %vm355_vm1 = vcmp.eq.f32.partialorder %v350_v58, inf  ;;  %v358_v5 = vand.u32 2147483648, %v350_v58  ;;  %vm357_vm3 = vcmp.eq.f32.partialorder %v350_v58, 0.0 }
 0x242   : > { %v352_v59 = vpop.xlane.xlu1 %351 }
 0x243   : > { %746 = vrsqrt.f32 %v352_v59  ;;  %v370_v60 = vpop.xlane.xlu0 %369  ;;  %vm362_vm4 = vcmp.eq.f32.partialorder %v352_v59, inf  ;;  %v365_v13 = vand.u32 2147483648, %v352_v59  ;;  %vm364_vm7 = vcmp.eq.f32.partialorder %v352_v59, 0.0 }
 0x244   : > { %748 = vrsqrt.f32 %v370_v60  ;;  %vm375_vm2 = vcmp.eq.f32.partialorder %v370_v60, inf  ;;  %v378_v6 = vand.u32 2147483648, %v370_v60  ;;  %vm377_vm5 = vcmp.eq.f32.partialorder %v370_v60, 0.0 }
 0x246   : > { %v372_v61 = vpop.xlane.xlu1 %371 }
 0x247   : > { %750 = vrsqrt.f32 %v372_v61  ;;  %vm382_vm6 = vcmp.eq.f32.partialorder %v372_v61, inf  ;;  %v385_v14 = vand.u32 2147483648, %v372_v61  ;;  %vm384_vm8 = vcmp.eq.f32.partialorder %v372_v61, 0.0  ;;  %v344_v24 = vpop.xlane.xlu0 %343 }
 0x249   : > { %v745_v62 = vpop.eup %744 }
 0x24a   : > { %v354_v63 = vmul.f32 %v745_v62, %v350_v58  ;;  %v346_v25 = vpop.xlane.xlu1 %345 }
 0x24c   : > { %v356_v3 = vsel %vm355_vm1, %v350_v58, %v354_v63 }
 0x24d   : > { %v747_v0 = vpop.eup %746  ;;  %v359_v11 = vsel %vm357_vm3, %v358_v5, %v356_v3 }
 0x24e   : > { %v749_v1 = vpop.eup %748  ;;  %v361_v2 = vmul.f32 %v747_v0, %v352_v59 }
 0x24f   : > { %v374_v4 = vmul.f32 %v749_v1, %v370_v60 }
 0x250   : > { %v363_v9 = vsel %vm362_vm4, %v352_v59, %v361_v2 }
 0x251   : > { %v751_v7 = vpop.eup %750  ;;  %v376_v8 = vsel %vm375_vm2, %v370_v60, %v374_v4  ;;  %v366_v18 = vsel %vm364_vm7, %v365_v13, %v363_v9 }
 0x252   : > { %v381_v10 = vmul.f32 %v751_v7, %v372_v61  ;;  %v379_v12 = vsel %vm377_vm5, %v378_v6, %v376_v8 }
 0x253   : > { %v387_v15 = vmul.f32 %v379_v12, %v359_v11 }
 0x254   : > { %v383_v16 = vsel %vm382_vm6, %v372_v61, %v381_v10 }
 0x255   : > { %v389_v17 = vadd.f32 1e-08, %v387_v15  ;;  %v386_v19 = vsel %vm384_vm8, %v385_v14, %v383_v16 }
 0x256   : > { %v388_v20 = vmul.f32 %v386_v19, %v366_v18 }
 0x257   : > { %752 = vrcp.f32 %v389_v17 }
 0x258   : > { %v390_v21 = vadd.f32 1e-08, %v388_v20 }
 0x25a   : > { %754 = vrcp.f32 %v390_v21 }
 0x261   : > { %v753_v22 = vpop.eup %752 }
 0x262   : > { %v393_v26 = vmul.f32 %v753_v22, %v344_v24 }
 0x264   : > { %v755_v23 = vpop.eup %754 }
 0x265   : > { %v394_v27 = vmul.f32 %v755_v23, %v346_v25 }
 0x267   : > { %v396_v29 = vadd.f32 %v394_v27, %v393_v26 }
 0x269   : > { %v397_v30 = vadd.f32 %v396_v29, %v395_v28 }
 0x26b   : > { %399 = vst.msk [vmem:[%s1203_s20] sm:$0xff] %vm398_vm9, %v397_v30 }
 0x26c PF: > { %p634_p4 = scmp.ge.s32.totalorder %s942_s22, 2  ;;  %s460_s15 = sand.u32 1, %s902_s12  }
 0x26d   : > { %p1328_p2 = scmp.ne.s32.totalorder %s1319_s27, 0  ;;  %s461_s18 = scalar_lea.sflag [#allocation4], %s460_s15 }
 0x26f   : > { %p630_p3 = pnand %p634_p4, %p1328_p2 }
 0x271   : > { %897 = dma.done.wait (!%p630_p3), %s461_s18, 640  }
 0x272   : > { %899 = vsyncadd (!%p630_p3), %s461_s18, 4294966656  ;;  %s23_s22 = sadd.s32 1, %s942_s22   ;;  %s1329_s20 = sld [smem:[#allocation15_spill]] }
 0x273   : > { %p20_p0 = scmp.ge.s32.totalorder %s23_s22, 6   ;;  %s1330_s18 = sld [smem:[#allocation11_spill]] }
 0x274   : > { %s1331_s19 = sld [smem:[#allocation12_spill]]  ;;  %s1332_s7 = sld [smem:[#allocation13_spill]] }
 0x275   : > { %s1333_s21 = sld [smem:[#allocation14_spill]]  ;;  %s1334_s12 = smov %s906_s13 }
 0x276   : > { %s1335_s13 = smov %s910_s14  ;;  %s1336_s14 = smov %s1062_s9 }
 0x277   : > { %s1337_s15 = smov %s918_s16  ;;  %s1338_s16 = smov %s922_s17 }
 0x278   : > { %s1339_s17 = smov %s1329_s20  ;;  %22 = sbr.rel (!%p20_p0) target bundleno = 13 (0xd), region = 106 }
 0x27a   : > { %s1340_s20 = smov %s1332_s7 }
 0x27f   :  { %473 = vsyncpa [#allocation3], 1 }
 0x280   :  { %475 = vsyncpa [#allocation3 + $0x1], 1 }
 0x281   :  { %476 = vsyncpa [#allocation6], 1 }
 0x282   :  { %478 = vsyncpa [#allocation6 + $0x1], 1 }
 0x283   :  { %479 = vsyncpa [#allocation4], 1 }
 0x284   :  { %481 = vsyncpa [#allocation4 + $0x1], 1 }

</bundles_post_ra>
